<compile_context>
chip_gen: v5e
topology: v5e:2x2
jax: 0.10.0
libtpu: 0.0.40
codegen_flags: <defaults>
</compile_context>

<pallas_src>
import math
import functools

import jax
import jax.numpy as jnp
from jax import lax
from jax.experimental import pallas as pl
from jax.experimental.pallas import tpu as pltpu


def _flash_sdpa_kernel(q_ref, kt_ref, v_ref, o_ref,
                       m_sc, l_sc, acc_sc, q_sc,
                       *, scale, k_valid, k_padded, block_k, compute_dtype):
    """One (q-tile, kv-tile) step of online-softmax attention.

    Refs (batch dim squeezed out by pl.Squeezed()):
      q_ref:  (TQ, D)  query tile (native dtype)
      kt_ref: (D, TK)  key tile, pre-transposed so TK sits on lanes
      v_ref:  (TK, D)  value tile
      o_ref:  (TQ, D)  output tile (written only on the last kv step)
    Scratch (persists across the kv grid axis):
      m_sc:   (TQ, 1)  running row max (f32)
      l_sc:   (TQ, 1)  running softmax denominator (f32)
      acc_sc: (TQ, D)  running weighted sum (f32)
      q_sc:   (TQ, D)  Q * 1/sqrt(d), cached in the MXU compute dtype
    """
    kv = pl.program_id(2)

    @pl.when(kv == 0)
    def _init():
        m_sc[...] = jnp.full_like(m_sc, -jnp.inf)
        l_sc[...] = jnp.zeros_like(l_sc)
        acc_sc[...] = jnp.zeros_like(acc_sc)
        # Scale applied once per q tile, in f32, then cast once for the MXU.
        q_sc[...] = (q_ref[...].astype(jnp.float32)
                     * jnp.float32(scale)).astype(q_sc.dtype)

    # score tile (TQ, TK) = (Q*scale) @ K^T — compute_dtype operands, f32 acc.
    s = jnp.dot(q_sc[...], kt_ref[...].astype(compute_dtype),
                preferred_element_type=jnp.float32)

    if k_padded != k_valid:
        # Mask key columns introduced by wrapper-side padding to a 128 multiple.
        col = kv * block_k + lax.broadcasted_iota(jnp.int32, s.shape, 1)
        s = jnp.where(col < k_valid, s, -jnp.inf)

    m_prev = m_sc[...]
    m_new = jnp.maximum(m_prev, jnp.max(s, axis=-1, keepdims=True))
    alpha = jnp.exp(m_prev - m_new)          # rescale factor for old state
    p = jnp.exp(s - m_new)                   # unnormalized probabilities (f32)

    l_sc[...] = alpha * l_sc[...] + jnp.sum(p, axis=-1, keepdims=True)
    acc_sc[...] = alpha * acc_sc[...] + jnp.dot(
        p.astype(compute_dtype), v_ref[...].astype(compute_dtype),
        preferred_element_type=jnp.float32)
    m_sc[...] = m_new

    @pl.when(kv == pl.num_programs(2) - 1)
    def _finalize():
        # Finalize runs once per q tile (off the kv loop) — exact reciprocal is
        # wall-clock free and keeps tight agreement with the reference.
        inv_l = pl.reciprocal(l_sc[...], approx=False)
        o_ref[...] = (acc_sc[...] * inv_l).astype(o_ref.dtype)


def _pick_tile(n, preferred, align):
    """Largest tile <= preferred that divides n and is `align`-aligned,
    falling back to the full extent (always a legal block shape)."""
    if n <= preferred:
        return n
    t = (preferred // align) * align
    while t >= align:
        if n % t == 0:
            return t
        t -= align
    return n


def _round_up(n, m):
    return ((n + m - 1) // m) * m


def _tpu_chip():
    """(physical VMEM bytes, device_kind lowercase) with safe fallbacks."""
    vmem = None
    try:
        vmem = getattr(pltpu.get_tpu_info(), "vmem_capacity_bytes", None)
    except Exception:
        vmem = None
    if not vmem:
        vmem = 64 * 2 ** 20          # conservative fallback: v7x per-core VMEM
    kind = ""
    try:
        kind = jax.devices()[0].device_kind.lower()
    except Exception:
        pass
    return int(vmem), kind


def scaled_dot_product_attention(query, key, value, *, tq=256, tk=None):
    """Pallas flash-SDPA.

    query: (B, q_len, D), key/value: (B, k_len, D) -> context: (B, q_len, D)
    """
    B, q_len, d_model = query.shape
    _, k_len, _ = key.shape
    scale = 1.0 / math.sqrt(d_model)

    phys_vmem, kind = _tpu_chip()
    is_v5 = "v5" in kind
    if tk is None:
        # v6e/v7x HBM easily feeds a larger kv burst; keep 512 on v5e.
        tk = 512 if is_v5 else 1024

    # bf16 MXU operands (f32 accumulation) whenever inputs are full precision.
    in_dtype = jnp.dtype(query.dtype)
    compute_dtype = jnp.bfloat16 if in_dtype.itemsize >= 4 else query.dtype

    # ---- q tiling (Q/O/acc stay resident across the kv axis) ----
    TQ = _pick_tile(q_len, tq, 8)
    if B * (q_len // TQ) < 2 and TQ > 8:
        # v7x megacore: make sure the parallel axes have >= 2 programs.
        smaller = _pick_tile(q_len, max(8, TQ // 2), 8)
        if smaller < TQ and q_len // smaller >= 2:
            TQ = smaller
    n_q_tiles = q_len // TQ

    # ---- kv tiling: pad k_len to a multiple of 128 so the score tile is
    # lane-dense; padded key columns are masked to -inf in the kernel. ----
    k_pad = _round_up(k_len, 128)
    TK = _pick_tile(k_pad, tk, 128)
    if k_pad != k_len:
        pad = [(0, 0), (0, k_pad - k_len), (0, 0)]
        key = jnp.pad(key, pad)
        value = jnp.pad(value, pad)
    # Lane-dense K: (B, D, k_pad) so the K block is (D, TK) with TK on lanes.
    key_t = jnp.transpose(key, (0, 2, 1))

    grid = (B, n_q_tiles, k_pad // TK)

    kernel = functools.partial(
        _flash_sdpa_kernel, scale=scale, k_valid=k_len, k_padded=k_pad,
        block_k=TK, compute_dtype=compute_dtype)

    def kv_spec(shape, index_map):
        # v5e: deepen K/V buffering to hide its lower HBM bandwidth.
        if is_v5:
            return pl.BlockSpec(shape, index_map, pipeline_mode=pl.Buffered(3))
        return pl.BlockSpec(shape, index_map)

    in_specs = [
        pl.BlockSpec((pl.Squeezed(), TQ, d_model), lambda b, qi, ki: (b, qi, 0)),
        kv_spec((pl.Squeezed(), d_model, TK), lambda b, qi, ki: (b, 0, ki)),
        kv_spec((pl.Squeezed(), TK, d_model), lambda b, qi, ki: (b, ki, 0)),
    ]
    # TODO(synk): for d_model < 128 (real V2X head dims) the output store is
    # lane-masked; in the full multi-head model, fold heads into the last dim
    # in the wrapper for lane-dense stores.
    out_specs = pl.BlockSpec((pl.Squeezed(), TQ, d_model),
                             lambda b, qi, ki: (b, qi, 0))

    # Explicit VMEM budget from the chosen tiles, capped at 75% of physical
    # VMEM (leaves compiler headroom; never hands v7x its whole 64 MiB).
    item = in_dtype.itemsize
    c_item = jnp.dtype(compute_dtype).itemsize
    kv_bufs = 3 if is_v5 else 2
    tile_bytes = (2 * TQ * d_model * item            # Q (double-buffered)
                  + 2 * TQ * d_model * item          # O
                  + kv_bufs * d_model * TK * item    # K^T
                  + kv_bufs * TK * d_model * item)   # V
    scratch_bytes = (2 * TQ + TQ * d_model) * 4 + TQ * d_model * c_item
    score_bytes = 3 * TQ * TK * 4                    # s/p intermediates headroom
    need = tile_bytes + scratch_bytes + score_bytes
    vmem_cap = (phys_vmem * 3) // 4
    vmem_limit = int(min(vmem_cap, max(16 * 2 ** 20, 2 * need)))

    cost = pl.CostEstimate(
        flops=4 * B * q_len * k_pad * d_model,               # two matmuls
        transcendentals=B * q_len * k_pad,                   # exp per score elem
        bytes_accessed=item * (2 * B * q_len * d_model       # Q read + O write
                               + 2 * B * n_q_tiles * k_pad * d_model),  # K/V per q tile
    )

    return pl.pallas_call(
        kernel,
        out_shape=jax.ShapeDtypeStruct((B, q_len, d_model), query.dtype),
        grid_spec=pltpu.PrefetchScalarGridSpec(
            num_scalar_prefetch=0,
            grid=grid,
            in_specs=in_specs,
            out_specs=out_specs,
            scratch_shapes=[
                pltpu.VMEM((TQ, 1), jnp.float32),            # running max
                pltpu.VMEM((TQ, 1), jnp.float32),            # running denom
                pltpu.VMEM((TQ, d_model), jnp.float32),      # accumulator
                pltpu.VMEM((TQ, d_model), compute_dtype),    # scaled Q cache
            ],
        ),
        compiler_params=pltpu.CompilerParams(
            dimension_semantics=("parallel", "parallel", "arbitrary"),
            vmem_limit_bytes=vmem_limit,
        ),
        cost_estimate=cost,
    )(query, key_t, value)


def _reference(query, key, value):
    d = query.shape[-1]
    score = jnp.einsum("bqd,bkd->bqk", query, key) / math.sqrt(d)
    attn = jax.nn.softmax(score, axis=-1)
    return jnp.einsum("bqk,bkd->bqd", attn, value)


if __name__ == "__main__":
    key0 = jax.random.PRNGKey(0)
    kq, kk, kv = jax.random.split(key0, 3)

    batch, q_len, k_len, d_model = 2, 8, 8, 32
    query = jax.random.normal(kq, (batch, q_len, d_model), dtype=jnp.float32)
    key_ = jax.random.normal(kk, (batch, k_len, d_model), dtype=jnp.float32)
    value = jax.random.normal(kv, (batch, k_len, d_model), dtype=jnp.float32)

    context = scaled_dot_product_attention(query, key_, value)
    context = jax.block_until_ready(context)

    ref = _reference(query, key_, value)
    assert context.shape == (batch, q_len, d_model)
    # bf16 MXU operands (f32 accumulation) bound the error well below 2e-2;
    # the finalize reciprocal is exact.
    assert jnp.allclose(context, ref, atol=2e-2, rtol=2e-2), "mismatch vs reference"

    print("KERNEL_OK")
</pallas_src>

<mosaic_0001>
module attributes {stable_mosaic.version = 11 : i64} {
  func.func @_flash_sdpa_kernel(%arg0: i32, %arg1: i32, %arg2: i32, %arg3: memref<1x8x32xf32, #tpu.memory_space<vmem>>, %arg4: memref<1x32x128xf32, #tpu.memory_space<vmem>>, %arg5: memref<1x128x32xf32, #tpu.memory_space<vmem>>, %arg6: memref<1x8x32xf32, #tpu.memory_space<vmem>>, %arg7: memref<8x1xf32, #tpu.memory_space<vmem>>, %arg8: memref<8x1xf32, #tpu.memory_space<vmem>>, %arg9: memref<8x32xf32, #tpu.memory_space<vmem>>, %arg10: memref<8x32xbf16, #tpu.memory_space<vmem>>) attributes {dimension_semantics = [#tpu.dimension_semantics<parallel>, #tpu.dimension_semantics<parallel>, #tpu.dimension_semantics<arbitrary>], iteration_bounds = array<i64: 2, 1, 1>, scalar_prefetch = 0 : i64, scratch_operands = 4 : i64, tpu.core_type = #tpu.core_type<tc>, window_params = [{transform_indices = @transform_0, window_bounds = array<i64: 1, 8, 32>}, {transform_indices = @transform_1, window_bounds = array<i64: 1, 32, 128>}, {transform_indices = @transform_2, window_bounds = array<i64: 1, 128, 32>}, {transform_indices = @transform_3, window_bounds = array<i64: 1, 8, 32>}]} {
    %c0_i32 = arith.constant 0 : i32
    %0 = arith.cmpi eq, %arg2, %c0_i32 : i32
    %1 = arith.extui %0 : i1 to i32
    %c0_i32_0 = arith.constant 0 : i32
    %2 = arith.cmpi ne, %1, %c0_i32_0 : i32
    scf.if %2 {
      %cst_26 = arith.constant 0xFF800000 : f32
      %45 = vector.broadcast %cst_26 : f32 to vector<8x1xf32>
      %c0_27 = arith.constant 0 : index
      %c0_28 = arith.constant 0 : index
      %46 = vector.load %arg7[%c0_27, %c0_28] : memref<8x1xf32, #tpu.memory_space<vmem>>, vector<8x1xf32>
      tpu.vector_store %arg7[%c0_27, %c0_28], %45 {strides = array<i32>} : memref<8x1xf32, #tpu.memory_space<vmem>>, vector<8x1xf32>,
      %cst_29 = arith.constant 0.000000e+00 : f32
      %47 = vector.broadcast %cst_29 : f32 to vector<8x1xf32>
      %c0_30 = arith.constant 0 : index
      %c0_31 = arith.constant 0 : index
      %48 = vector.load %arg8[%c0_30, %c0_31] : memref<8x1xf32, #tpu.memory_space<vmem>>, vector<8x1xf32>
      tpu.vector_store %arg8[%c0_30, %c0_31], %47 {strides = array<i32>} : memref<8x1xf32, #tpu.memory_space<vmem>>, vector<8x1xf32>,
      %cst_32 = arith.constant 0.000000e+00 : f32
      %49 = vector.broadcast %cst_32 : f32 to vector<8x32xf32>
      %c0_33 = arith.constant 0 : index
      %c0_34 = arith.constant 0 : index
      %50 = vector.load %arg9[%c0_33, %c0_34] : memref<8x32xf32, #tpu.memory_space<vmem>>, vector<8x32xf32>
      tpu.vector_store %arg9[%c0_33, %c0_34], %49 {strides = array<i32>} : memref<8x32xf32, #tpu.memory_space<vmem>>, vector<8x32xf32>,
      %c0_35 = arith.constant 0 : index
      %c0_36 = arith.constant 0 : index
      %c0_37 = arith.constant 0 : index
      %51 = vector.load %arg3[%c0_35, %c0_36, %c0_37] : memref<1x8x32xf32, #tpu.memory_space<vmem>>, vector<1x8x32xf32>
      %52 = vector.shape_cast %51 : vector<1x8x32xf32> to vector<8x32xf32>
      %cst_38 = arith.constant 0.176776692 : f32
      %53 = vector.broadcast %cst_38 : f32 to vector<8x32xf32>
      %54 = arith.mulf %52, %53 : vector<8x32xf32>
      %55 = arith.truncf %54 : vector<8x32xf32> to vector<8x32xbf16>
      %c0_39 = arith.constant 0 : index
      %c0_40 = arith.constant 0 : index
      %56 = vector.load %arg10[%c0_39, %c0_40] : memref<8x32xbf16, #tpu.memory_space<vmem>>, vector<8x32xbf16>
      tpu.vector_store %arg10[%c0_39, %c0_40], %55 {strides = array<i32>} : memref<8x32xbf16, #tpu.memory_space<vmem>>, vector<8x32xbf16>,
    } else {
    }
    %c0 = arith.constant 0 : index
    %c0_1 = arith.constant 0 : index
    %3 = vector.load %arg10[%c0, %c0_1] : memref<8x32xbf16, #tpu.memory_space<vmem>>, vector<8x32xbf16>
    %c0_2 = arith.constant 0 : index
    %c0_3 = arith.constant 0 : index
    %c0_4 = arith.constant 0 : index
    %4 = vector.load %arg4[%c0_2, %c0_3, %c0_4] : memref<1x32x128xf32, #tpu.memory_space<vmem>>, vector<1x32x128xf32>
    %5 = vector.shape_cast %4 : vector<1x32x128xf32> to vector<32x128xf32>
    %6 = arith.truncf %5 : vector<32x128xf32> to vector<32x128xbf16>
    %cst = arith.constant dense<0.000000e+00> : vector<8x128xf32>
    %7 = tpu.matmul %3, %6, %cst {dimension_numbers = #tpu.dot_dimension_numbers<[1], [0], [0], [1], [0, 0, 1, 1], [], []>} : vector<8x32xbf16>, vector<32x128xbf16>, vector<8x128xf32> -> vector<8x128xf32>
    %c128_i32 = arith.constant 128 : i32
    %8 = arith.muli %arg2, %c128_i32 : i32
    %9 = tpu.iota {dimensions = array<i32: 1>} : vector<8x128xi32>
    %10 = vector.broadcast %8 : i32 to vector<8x128xi32>
    %11 = arith.addi %10, %9 : vector<8x128xi32>
    %c8_i32 = arith.constant 8 : i32
    %12 = vector.broadcast %c8_i32 : i32 to vector<8x128xi32>
    %13 = arith.cmpi slt, %11, %12 : vector<8x128xi32>
    %cst_5 = arith.constant 0xFF800000 : f32
    %14 = vector.broadcast %cst_5 : f32 to vector<8x128xf32>
    %15 = arith.select %13, %7, %14 : vector<8x128xi1>, vector<8x128xf32>
    %c0_6 = arith.constant 0 : index
    %c0_7 = arith.constant 0 : index
    %16 = vector.load %arg7[%c0_6, %c0_7] : memref<8x1xf32, #tpu.memory_space<vmem>>, vector<8x1xf32>
    %cst_8 = arith.constant dense<0xFF800000> : vector<8xf32>
    %17 = vector.multi_reduction <maximumf>, %15, %cst_8 [1] : vector<8x128xf32> to vector<8xf32>
    %18 = vector.shape_cast %17 : vector<8xf32> to vector<8x1xf32>
    %19 = arith.maximumf %16, %18 : vector<8x1xf32>
    %20 = arith.subf %16, %19 : vector<8x1xf32>
    %21 = math.exp %20 : vector<8x1xf32>
    %22 = vector.broadcast %19 : vector<8x1xf32> to vector<8x128xf32>
    %23 = arith.subf %15, %22 : vector<8x128xf32>
    %24 = math.exp %23 : vector<8x128xf32>
    %c0_9 = arith.constant 0 : index
    %c0_10 = arith.constant 0 : index
    %25 = vector.load %arg8[%c0_9, %c0_10] : memref<8x1xf32, #tpu.memory_space<vmem>>, vector<8x1xf32>
    %26 = arith.mulf %21, %25 : vector<8x1xf32>
    %cst_11 = arith.constant dense<0.000000e+00> : vector<8xf32>
    %27 = vector.multi_reduction <add>, %24, %cst_11 [1] : vector<8x128xf32> to vector<8xf32>
    %28 = vector.shape_cast %27 : vector<8xf32> to vector<8x1xf32>
    %29 = arith.addf %26, %28 : vector<8x1xf32>
    %c0_12 = arith.constant 0 : index
    %c0_13 = arith.constant 0 : index
    %30 = vector.load %arg8[%c0_12, %c0_13] : memref<8x1xf32, #tpu.memory_space<vmem>>, vector<8x1xf32>
    tpu.vector_store %arg8[%c0_12, %c0_13], %29 {strides = array<i32>} : memref<8x1xf32, #tpu.memory_space<vmem>>, vector<8x1xf32>,
    %c0_14 = arith.constant 0 : index
    %c0_15 = arith.constant 0 : index
    %31 = vector.load %arg9[%c0_14, %c0_15] : memref<8x32xf32, #tpu.memory_space<vmem>>, vector<8x32xf32>
    %32 = vector.broadcast %21 : vector<8x1xf32> to vector<8x32xf32>
    %33 = arith.mulf %32, %31 : vector<8x32xf32>
    %34 = arith.truncf %24 : vector<8x128xf32> to vector<8x128xbf16>
    %c0_16 = arith.constant 0 : index
    %c0_17 = arith.constant 0 : index
    %c0_18 = arith.constant 0 : index
    %35 = vector.load %arg5[%c0_16, %c0_17, %c0_18] : memref<1x128x32xf32, #tpu.memory_space<vmem>>, vector<1x128x32xf32>
    %36 = vector.shape_cast %35 : vector<1x128x32xf32> to vector<128x32xf32>
    %37 = arith.truncf %36 : vector<128x32xf32> to vector<128x32xbf16>
    %cst_19 = arith.constant dense<0.000000e+00> : vector<8x32xf32>
    %38 = tpu.matmul %34, %37, %cst_19 {dimension_numbers = #tpu.dot_dimension_numbers<[1], [0], [0], [1], [0, 0, 1, 1], [], []>} : vector<8x128xbf16>, vector<128x32xbf16>, vector<8x32xf32> -> vector<8x32xf32>
    %39 = arith.addf %33, %38 : vector<8x32xf32>
    %c0_20 = arith.constant 0 : index
    %c0_21 = arith.constant 0 : index
    %40 = vector.load %arg9[%c0_20, %c0_21] : memref<8x32xf32, #tpu.memory_space<vmem>>, vector<8x32xf32>
    tpu.vector_store %arg9[%c0_20, %c0_21], %39 {strides = array<i32>} : memref<8x32xf32, #tpu.memory_space<vmem>>, vector<8x32xf32>,
    %c0_22 = arith.constant 0 : index
    %c0_23 = arith.constant 0 : index
    %41 = vector.load %arg7[%c0_22, %c0_23] : memref<8x1xf32, #tpu.memory_space<vmem>>, vector<8x1xf32>
    tpu.vector_store %arg7[%c0_22, %c0_23], %19 {strides = array<i32>} : memref<8x1xf32, #tpu.memory_space<vmem>>, vector<8x1xf32>,
    %c0_i32_24 = arith.constant 0 : i32
    %42 = arith.cmpi eq, %arg2, %c0_i32_24 : i32
    %43 = arith.extui %42 : i1 to i32
    %c0_i32_25 = arith.constant 0 : i32
    %44 = arith.cmpi ne, %43, %c0_i32_25 : i32
    scf.if %44 {
      %c0_26 = arith.constant 0 : index
      %c0_27 = arith.constant 0 : index
      %45 = vector.load %arg8[%c0_26, %c0_27] : memref<8x1xf32, #tpu.memory_space<vmem>>, vector<8x1xf32>
      %46 = tpu.reciprocal %45 : vector<8x1xf32> -> vector<8x1xf32>
      %c0_28 = arith.constant 0 : index
      %c0_29 = arith.constant 0 : index
      %47 = vector.load %arg9[%c0_28, %c0_29] : memref<8x32xf32, #tpu.memory_space<vmem>>, vector<8x32xf32>
      %48 = vector.broadcast %46 : vector<8x1xf32> to vector<8x32xf32>
      %49 = arith.mulf %47, %48 : vector<8x32xf32>
      %c0_30 = arith.constant 0 : index
      %c0_31 = arith.constant 0 : index
      %c0_32 = arith.constant 0 : index
      %50 = vector.load %arg6[%c0_30, %c0_31, %c0_32] : memref<1x8x32xf32, #tpu.memory_space<vmem>>, vector<1x8x32xf32>
      %51 = vector.shape_cast %50 : vector<1x8x32xf32> to vector<8x32xf32>
      %52 = vector.shape_cast %49 : vector<8x32xf32> to vector<1x8x32xf32>
      tpu.vector_store %arg6[%c0_30, %c0_31, %c0_32], %52 {strides = array<i32>} : memref<1x8x32xf32, #tpu.memory_space<vmem>>, vector<1x8x32xf32>,
    } else {
    }
    return
  }
  func.func @transform_0(%arg0: i32, %arg1: i32, %arg2: i32) -> (i32, i32, i32) {
    %c0_i32 = arith.constant 0 : i32
    %c0_i32_0 = arith.constant 0 : i32
    return %arg0, %arg1, %c0_i32 : i32, i32, i32
  }
  func.func @transform_1(%arg0: i32, %arg1: i32, %arg2: i32) -> (i32, i32, i32) {
    %c0_i32 = arith.constant 0 : i32
    %c0_i32_0 = arith.constant 0 : i32
    return %arg0, %c0_i32, %arg2 : i32, i32, i32
  }
  func.func @transform_2(%arg0: i32, %arg1: i32, %arg2: i32) -> (i32, i32, i32) {
    %c0_i32 = arith.constant 0 : i32
    %c0_i32_0 = arith.constant 0 : i32
    return %arg0, %arg2, %c0_i32 : i32, i32, i32
  }
  func.func @transform_3(%arg0: i32, %arg1: i32, %arg2: i32) -> (i32, i32, i32) {
    %c0_i32 = arith.constant 0 : i32
    %c0_i32_0 = arith.constant 0 : i32
    return %arg0, %arg1, %c0_i32 : i32, i32, i32
  }
}

</mosaic_0001>

<bundles_post_ra>
// kernel: tpu_custom_call.1
= control target key start
LH: loop header
LB: loop body
LE: loop exit
PB: predicated region body
PF: predicated region fallthrough
CT: control target
= control target key end

     0   :  { %8 = vsyncpa [#allocation7], 0  ;;  %s856_s0 = inlined_call_operand.vmem [shape: f32[2,8,32], index: 0, kind: input, shape index: {}]   ;;  %s857_s1 = inlined_call_operand.vmem [shape: f32[2,32,128], index: 1, kind: input, shape index: {}]   ;;  %s858_s2 = inlined_call_operand.vmem [shape: f32[2,128,32], index: 2, kind: input, shape index: {}]   ;;  %s859_s3 = inlined_call_operand.hbm [shape: f32[2,8,32], index: 3, kind: output, shape index: {}]  }
   0x1   :  { %10 = vsyncpa [#allocation7 + $0x1], 0  ;;  %s722_s12 = smov 0   ;;  %s724_s13 = smov 0  }
   0x2   :  { %s726_s14 = smov 0   ;;  %s728_s15 = smov 0  }
   0x3   :  { %s730_s16 = smov 0   ;;  %s732_s17 = smov 0  }
   0x4 LB: > { %s534_s18 = sadd.s32 4294967295, %s697_s17   ;;  %s535_s19 = sadd.s32 4294967294, %s697_s17   ;;  %s697_s17 = sphi %s732_s17, %s16_s17   ;;  %s693_s16 = sphi %s730_s16, %s866_s16   ;;  %s689_s15 = sphi %s728_s15, %s865_s15   ;;  %s685_s14 = sphi %s726_s14, %s864_s14   ;;  %s681_s13 = sphi %s724_s13, %s863_s13   ;;  %s677_s12 = sphi %s722_s12, %s862_s12  }
   0x5   : > { %s35_s20 = sadd.s32 1, %s693_s16  ;;  %s128_s21 = sadd.s32 1, %s685_s14 }
   0x6   : > { %p37_p0 = scmp.ge.s32.totalorder %s35_s20, 2  ;;  %p138_p1 = scmp.ne.s32.totalorder %s685_s14, %s681_s13 }
   0x7   : > { %p139_p2 = scmp.eq.s32.totalorder %s534_s18, 1  ;;  %p144_p3 = scmp.ne.s32.totalorder %s681_s13, %s677_s12 }
   0x8   : > { %s868_s20 = smov (%p37_p0, %s35_s20), 0  ;;  %p145_p5 = scmp.eq.s32.totalorder %s535_s19, 1 }
   0x9   : > { %p762_p4 = por %p139_p2, %p138_p1  ;;  %s123_s23 = ssub.s32 %s693_s16, %s868_s20 }
   0xa   : > { %p538_p6 = scmp.ge.s32.totalorder %s697_s17, 1  ;;  %p126_p7 = scmp.eq.s32.totalorder %s123_s23, 0 }
   0xb   : > { %p769_p8 = por %p145_p5, %p144_p3  ;;  %p197_p9 = scmp.lt.s32.totalorder %s697_s17, 3 }
   0xc   : > { %s775_s25 = scalar_select %p126_p7, %s685_s14, %s128_s21  }
   0xd   : > { %p198_p10 = pnand %p538_p6, %p197_p9 }
   0xe   : > { %p240_p11 = scmp.lt.s32.totalorder (!%p198_p10), %s689_s15, 1  ;;  %s237_s18 = sand.u32 (!%p198_p10), 1, %s681_s13  }
   0xf   : > { %201 = sbr.rel (%p198_p10) target bundleno = 647 (0x287), region = 32  ;;  %s539_s19 = sshll.u32 (!%p198_p10), %s237_s18, 3 }
  0x10   : > { %s547_s21 = sshll.u32 (!%p198_p10), %s689_s15, 3 }
  0x14   : > { %vm270_vm0 = vcmask 7168   ;;  %v699_v0 = vmov 0.0   ;;  %vm273_vm1 = vcmask 261120   ;;  %s780_s26 = scalar_select %p240_p11, %s689_s15, 1  ;;  %vm278_vm2 = vcmask 257024  }
  0x15   : > { %272 = vst.msk [vmem:[#allocation3] sm:$0xff] %vm270_vm0, %v699_v0  ;;  %v700_v11 = vmov -inf   ;;  %v305_v12 = vlaneseq  ;;  %v701_v17 = vmov 0  }
  0x16   : > { %274 = vst.msk [vmem:[#allocation4] sm:$0xff] %vm273_vm1, %v699_v0  ;;  %s540_s27 = sshll.u32 %s780_s26, 3  ;;  %s550_s28 = sshll.u32 %s780_s26, 5  ;;  %610 = vset.pattern.permute.xlu0 %v701_v17  ;;  %611 = vset.pattern.permute.xlu1 %v701_v17 }
  0x17   : > { %s246_s4 = scalar_lea.vmem %s856_s0, %s540_s27  ;;  %s254_s7 = scalar_lea.vmem %s857_s1, %s550_s28  ;;  %271 = vst.msk [vmem:[#allocation2] sm:$0xff] %vm270_vm0, %v700_v11  ;;  %v306_v13 = vand.u32 127, %v305_v12  ;;  %612 = vset.pattern.permute.xlu2 %v701_v17 }
  0x18   : > { %v275_v1 = vld [vmem:[%s246_s4] sm:$0xff]  ;;  %v283_v2 = vld [vmem:[%s254_s7 + $0x10] sm:$0xff]  ;;  %v284_v3 = vld [vmem:[%s254_s7 + $0x18] sm:$0xff]  ;;  %s551_s8 = sshll.u32 %s780_s26, 7  ;;  %s419_s27 = scalar_lea.hbm %s859_s3, %s547_s21 }
  0x19   : > { %v276_v4 = vmul.f32 0.17677669, %v275_v1  ;;  %v286_v5 = vpack.c.bf16 %v284_v3, %v283_v2  ;;  %v281_v6 = vld [vmem:[%s254_s7] sm:$0xff]  ;;  %v282_v7 = vld [vmem:[%s254_s7 + $0x8] sm:$0xff]  ;;  %vm309_vm3 = vcmp.lt.s32.totalorder %v306_v13, 8  ;;  %s797_s11 = scalar_lea.vmem %s858_s2, %s551_s8  ;;  %s239_s28 = scalar_lea.vmem [#allocation6], %s539_s19 }
  0x1a   : > { %v285_v9 = vpack.c.bf16 %v282_v7, %v281_v6  ;;  %v355_v18 = vld [vmem:[%s797_s11 + $0x70] sm:$0xff]  ;;  %v356_v19 = vld [vmem:[%s797_s11 + $0x78] sm:$0xff]  ;;  %v353_v20 = vld [vmem:[%s797_s11 + $0x60] sm:$0xff]  ;;  %s421_s29 = sshll.u32 %s239_s28, 4  ;;  %s423_s30 = sshll.u32 %s419_s27, 4  ;;  %s422_s29 = int_to_ptr.vmem [resolvable:$true] %s421_s29  ;;  %s424_s30 = int_to_ptr.hbm [resolvable:$true] %s423_s30 }
  0x1b   : > { %v277_v8 = vpack.c.bf16 %v276_v4, %v276_v4  ;;  %297 = vmatpush.bf16.msra.mxu0 %v286_v5  ;;  %v364_v21 = vpack.c.bf16 %v356_v19, %v355_v18  ;;  %v354_v22 = vld [vmem:[%s797_s11 + $0x68] sm:$0xff]  ;;  %v351_v24 = vld [vmem:[%s797_s11 + $0x50] sm:$0xff]  ;;  %v352_v25 = vld [vmem:[%s797_s11 + $0x58] sm:$0xff]  ;;  %s408_s4 = scalar_lea.sflag [#allocation7], %s237_s18  ;;  %s633_s5 = sshra.s32 %s424_s30, 4  ;;  %s634_s5 = int_to_ptr.hbm [resolvable:$true] %s633_s5 }
  0x1c   : > { %v363_v23 = vpack.c.bf16 %v354_v22, %v353_v20  ;;  %v362_v26 = vpack.c.bf16 %v352_v25, %v351_v24  ;;  %v349_v27 = vld [vmem:[%s797_s11 + $0x40] sm:$0xff]  ;;  %v350_v28 = vld [vmem:[%s797_s11 + $0x48] sm:$0xff]  ;;  %v347_v30 = vld [vmem:[%s797_s11 + $0x30] sm:$0xff]  ;;  %s635_s6 = scalar_lea.hbm %s634_s5, 8  ;;  %s639_s8 = scalar_lea.hbm %s859_s3, 16 }
  0x1d   : > { %279 = vst.msk [vmem:[#allocation5] sm:$0xf] %vm278_vm2, %v277_v8  ;;  %365 = vmatpush.bf16.msra.mxu1 %v364_v21  ;;  %v361_v29 = vpack.c.bf16 %v350_v28, %v349_v27  ;;  %v348_v31 = vld [vmem:[%s797_s11 + $0x38] sm:$0xff]  ;;  %v345_v37 = vld [vmem:[%s797_s11 + $0x20] sm:$0xff]  ;;  %v346_v38 = vld [vmem:[%s797_s11 + $0x28] sm:$0xff]  ;;  %p636_p12 = scmp.ne.s32.totalorder %s634_s5, %s635_s6  ;;  %p640_p1 = scmp.lt.s32.totalorder %s634_s5, %s859_s3 }
  0x1e   : > { %v360_v32 = vpack.c.bf16 %v348_v31, %v347_v30  ;;  %v311_v33 = vld [vmem:[#allocation2] sm:$0xff]  ;;  %v359_v39 = vpack.c.bf16 %v346_v38, %v345_v37  ;;  %v343_v40 = vld [vmem:[%s797_s11 + $0x10] sm:$0xff]  ;;  %v344_v41 = vld [vmem:[%s797_s11 + $0x18] sm:$0xff]  ;;  %p641_p2 = scmp.lt.s32.totalorder %s639_s8, %s635_s6 }
  0x1f   : > { %298 = vmatpush.bf16.msra.mxu0 %v285_v9  ;;  %v358_v42 = vpack.c.bf16 %v344_v41, %v343_v40  ;;  %v341_v43 = vld [vmem:[%s797_s11] sm:$0xff]  ;;  %v342_v44 = vld [vmem:[%s797_s11 + $0x8] sm:$0xff]  ;;  %v333_v0 = vld [vmem:[#allocation4] sm:$0xff]  ;;  %p637_p13 = pnand %p636_p12, %p762_p4 }
  0x20   : > { %v357_v45 = vpack.c.bf16 %v342_v44, %v341_v43  ;;  %v326_v53 = vld [vmem:[#allocation3] sm:$0xff]  ;;  %p642_p3 = por %p641_p2, %p640_p1 }
  0x21   : > { %366 = vmatpush.bf16.msra.mxu1 %v363_v23  ;;  %p638_p0 = pneg %p637_p13 }
  0x23   : > { %p643_p5 = pnand %p642_p3, %p638_p0 }
  0x24   : > { %v280_v10 = vld [vmem:[#allocation5] sm:$0xf] }
  0x25   : > { %545 = vmatmul.msk.bf16.vlgmr.msra.gmra.mxu0 %vm273_vm1, %v280_v10  ;;  %367 = vmatpush.bf16.msra.mxu1 %v362_v26 }
  0x29   : > { %368 = vmatpush.bf16.msra.mxu1 %v361_v29 }
  0x2d   : > { %369 = vmatpush.bf16.msra.mxu1 %v360_v32 }
  0x31   : > { %370 = vmatpush.bf16.msra.mxu1 %v359_v39 }
  0x35   : > { %371 = vmatpush.bf16.msra.mxu1 %v358_v42 }
  0x39   : > { %372 = vmatpush.bf16.msra.mxu1 %v357_v45 }
  0xa2   : > { %v300_v14 = vpop.f32.mrf.mxu0 }
  0xa3   : > { %v310_v15 = vsel %vm309_vm3, %v300_v14, -inf }
  0xa4   : > { %312 = vmax.xlane.f32.xlu0 %v310_v15 }
  0xaa   : > { %v302_v16 = vpop.f32.mrf.mxu0 }
 0x117   : > { %v313_v34 = vpop.xlane.xlu0 %312 }
 0x118   : > { %v314_v35 = vmax.f32 %v311_v33, %v313_v34 }
 0x11a   : > { %v315_v36 = vsub.f32 %v311_v33, %v314_v35  ;;  %380 = vst.msk [vmem:[#allocation2] sm:$0xff] %vm270_vm0, %v314_v35  ;;  %320 = vperm.xlu0 %610, %v314_v35  }
 0x11c   : > { %v316_v51 = vmul.f32 1.442695, %v315_v36 }
 0x18c   : > { %v321_v46 = vpop.permute.xlu0 %320 }
 0x18d   : > { %v323_v47 = vsub.f32 %v310_v15, %v321_v46 }
 0x18f   : > { %v324_v48 = vmul.f32 1.442695, %v323_v47 }
 0x191   : > { %613 = vpow2.f32 %v324_v48 }
 0x192   : > { %615 = vpow2.f32 %v316_v51 }
 0x197   : > { %v614_v49 = vpop.eup %613 }
 0x198   : > { %328 = vadd.xlane.f32.xlu1 %v614_v49  ;;  %v340_v50 = vpack.c.bf16 %v614_v49, %v614_v49  ;;  %v616_v52 = vpop.eup %615 }
 0x199   : > { %v327_v54 = vmul.f32 %v616_v52, %v326_v53 }
 0x19a   : > { %373 = vmatmul.bf16.vlgmr.msra.gmra.mxu1 %v340_v50 }
 0x1b1   : > { %336 = vperm.xlu1 %611, %v616_v52  }
 0x20b   : > { %v329_v55 = vpop.xlane.xlu1 %328 }
 0x20c   : > { %v330_v56 = vadd.f32 %v329_v55, %v327_v54 }
 0x20e   : > { %332 = vst.msk [vmem:[#allocation3] sm:$0xff] %vm270_vm0, %v330_v56 }
 0x215   : > { %v384_v57 = vld [vmem:[#allocation3] sm:$0xff] }
 0x216   : > { %617 = vrcp.f32 %v384_v57  ;;  %v396_v63 = vand.u32 2147483648, %v384_v57  ;;  %v394_v2 = vand.u32 2147483647, %v384_v57  ;;  %vm390_vm5 = vweird.f32 %v384_v57 }
 0x217   : > { %v374_v58 = vpop.f32.mrf.mxu1 }
 0x218   : > { %v397_v6 = vor.u32 1.1754944e-38, %v396_v63  ;;  %vm395_vm7 = vcmp.eq.f32.partialorder %v394_v2, 8.507059e+37 }
 0x21c   : > { %v618_v59 = vpop.eup %617 }
 0x21d   : > { %v386_v60 = vmul.f32 %v618_v59, %v384_v57  ;;  %vm391_vm4 = vweird.f32 %v618_v59 }
 0x21e   : > { %vm392_vm6 = vmor %vm390_vm5, %vm391_vm4 }
 0x21f   : > { %v376_v61 = vpop.f32.mrf.mxu1  ;;  %v387_v62 = vsub.f32 1.0, %v386_v60 }
 0x221   : > { %v388_v1 = vmul.f32 %v618_v59, %v387_v62 }
 0x223   : > { %v337_v3 = vpop.permute.xlu1 %336  ;;  %v389_v4 = vadd.f32 %v618_v59, %v388_v1 }
 0x224   : > { %v339_v5 = vmul.f32 %v337_v3, %v333_v0 }
 0x225   : > { %v393_v7 = vsel %vm392_vm6, %v618_v59, %v389_v4 }
 0x226   : > { %v378_v8 = vadd.f32 %v374_v58, %v339_v5  ;;  %v398_v9 = vsel %vm395_vm7, %v397_v6, %v393_v7 }
 0x227   : > { %402 = vperm.xlu2 %612, %v398_v9  }
 0x228   : > { %379 = vst.msk [vmem:[#allocation4] sm:$0xff] %vm273_vm1, %v378_v8 }
 0x22f   : > { %v399_v10 = vld [vmem:[#allocation4] sm:$0xff] }
 0x281   : > { %v403_v11 = vpop.permute.xlu2 %402 }
 0x282   : > { %v405_v12 = vmul.f32 %v403_v11, %v399_v10 }
 0x284   : > { %406 = vst.msk [vmem:[%s239_s28] sm:$0xff] %vm273_vm1, %v405_v12 }
 0x285   : > { %646 = shalt.err (!%p643_p5)
}
 0x286   : > { %552 = dma.vmem_to_hbm [thread:$0]  (%p762_p4), %s422_s29, 128, %s424_s30, %s408_s4  }
 0x287 PF: > { %p558_p6 = scmp.ge.s32.totalorder %s697_s17, 2  ;;  %s435_s11 = sand.u32 1, %s677_s12  }
 0x288   : > { %s436_s18 = scalar_lea.sflag [#allocation7], %s435_s11 }
 0x289   : > { %p555_p7 = pnand %p558_p6, %p769_p8 }
 0x28b   : > { %p556_p9 = pneg %p555_p7 }
 0x28d   : > { %672 = dma.done.wait (%p556_p9), %s436_s18, 128  }
 0x28e   : > { %674 = vsyncadd (%p556_p9), %s436_s18, 4294967168  ;;  %s16_s17 = sadd.s32 1, %s697_s17   ;;  %s862_s12 = smov %s681_s13 }
 0x28f   : > { %p13_p10 = scmp.ge.s32.totalorder %s16_s17, 4   ;;  %s863_s13 = smov %s685_s14 }
 0x290   : > { %s864_s14 = smov %s775_s25  ;;  %s865_s15 = smov %s693_s16 }
 0x291   : > { %s866_s16 = smov %s868_s20  ;;  %15 = sbr.rel (!%p13_p10) target bundleno = 4 (0x4), region = 81 }
 0x296   :  { %442 = vsyncpa [#allocation7], 1 }
 0x297   :  { %444 = vsyncpa [#allocation7 + $0x1], 1 }

</bundles_post_ra>
